<compile_context>
chip_gen: v6e
topology: v6e:2x2x1
jax: 0.10.0
libtpu: 0.0.40
codegen_flags: <defaults>
</compile_context>

<pallas_src>
import functools

import jax
import jax.numpy as jnp
from jax.experimental import pallas as pl
from jax.experimental.pallas import tpu as pltpu

_LANE = 128        # lane width of a vreg (last dim)
_SUBLANE = 8       # sublane count of a vreg (second-to-last dim)
_MAX_TILE_B = 512  # max rows per batch tile (multiple of 8); big tiles amortize
                   # per-grid-step overhead and approach the HBM roofline.


def _round_up(x, m):
    return ((x + m - 1) // m) * m


def _pad2(a, rows, cols):
    r, c = a.shape
    return jnp.pad(a, ((0, rows - r), (0, cols - c)))


def _choose_batch_tiling(batch):
    """Return (tile_b, n_tiles). tile_b is a multiple of 8 sublanes.

    Tiny batches -> one padded tile. Otherwise an even number of near-equal
    tiles (>= 2) so both v7x TensorCores get work; tiles capped at
    _MAX_TILE_B rows for v5e/v6e roofline behavior.
    """
    if batch <= 2 * _SUBLANE:
        return _round_up(max(batch, 1), _SUBLANE), 1
    n_tiles = 2
    while pl.cdiv(batch, n_tiles) > _MAX_TILE_B:
        n_tiles += 2
    tile_b = _round_up(pl.cdiv(batch, n_tiles), _SUBLANE)
    return tile_b, n_tiles


def mlp_policy_kernel(x_ref, w1_ref, b1_ref, w2_ref, b2_ref, w3_ref, b3_ref,
                      o_ref):
    # h1 = relu(x @ W1 + b1)   (MXU matmul, f32 accumulation; bias/ReLU in f32)
    h1 = jnp.dot(x_ref[...], w1_ref[...], preferred_element_type=jnp.float32)
    h1 = jnp.maximum(h1 + b1_ref[...], 0.0)
    # h2 = relu(h1 @ W2 + b2)
    h2 = jnp.dot(h1.astype(w2_ref.dtype), w2_ref[...],
                 preferred_element_type=jnp.float32)
    h2 = jnp.maximum(h2 + b2_ref[...], 0.0)
    # logits = h2 @ W3 + b3
    out = jnp.dot(h2.astype(w3_ref.dtype), w3_ref[...],
                  preferred_element_type=jnp.float32)
    o_ref[...] = (out + b3_ref[...]).astype(o_ref.dtype)


def prepare_policy_params(params, *, weight_dtype=jnp.float32):
    """Pad the hidden dim to a 128-lane boundary and cast weights ONCE.

    Hoisted out of the per-call forward (review: per-forward padding was an
    extra HBM write+read of every weight on each call).  The state dim (rows
    of W1) and the output dim (cols of W3) are left unpadded: obs and logits
    are streamed unpadded and the MXU zero-fills short edges internally.
    Biases stay f32 so the VPU bias-add/ReLU path is f32 on all chips.
    """
    w1, b1, w2, b2, w3, b3 = params
    s_dim, hidden = w1.shape
    out_dim = w3.shape[1]
    h_p = _round_up(hidden, _LANE)

    w1_p = _pad2(w1.astype(jnp.float32), s_dim, h_p).astype(weight_dtype)
    b1_p = _pad2(b1.reshape(1, -1).astype(jnp.float32), 1, h_p)
    w2_p = _pad2(w2.astype(jnp.float32), h_p, h_p).astype(weight_dtype)
    b2_p = _pad2(b2.reshape(1, -1).astype(jnp.float32), 1, h_p)
    w3_p = _pad2(w3.astype(jnp.float32), h_p, out_dim).astype(weight_dtype)
    b3_p = b3.reshape(1, -1).astype(jnp.float32)
    return (w1_p, b1_p, w2_p, b2_p, w3_p, b3_p)


@functools.partial(jax.jit, static_argnames=("action_num", "action_seg"))
def policy_forward(obs, padded_params, *, action_num, action_seg):
    """Pallas equivalent of Policy.forward.

    obs: (B, state_dim); padded_params: output of prepare_policy_params.
    Returns logits of shape (B, action_num, action_seg), f32.
    """
    w1, b1, w2, b2, w3, b3 = padded_params
    batch, s_dim = obs.shape
    out_dim = w3.shape[1]
    assert out_dim == action_num * action_seg
    assert w1.shape[0] == s_dim

    tile_b, n_tiles = _choose_batch_tiling(batch)
    b_pad = tile_b * n_tiles

    if obs.dtype != w1.dtype:
        obs = obs.astype(w1.dtype)
    if b_pad != batch:
        # Cheap row padding only (no lane padding of the feature dim).
        obs = jnp.pad(obs, ((0, b_pad - batch), (0, 0)))

    # Streamed tiles: obs/logits indexed by the grid step (double-buffered by
    # the BlockSpec pipeline).  Weights/biases use constant index_maps, so
    # they are DMA'd once and stay VMEM-resident across grid steps.
    x_spec = pl.BlockSpec((tile_b, s_dim), lambda i: (i, 0))
    o_spec = pl.BlockSpec((tile_b, out_dim), lambda i: (i, 0))

    def const_spec(shape):
        return pl.BlockSpec(shape, lambda i: (0, 0))

    # Scoped-VMEM sizing: only pass an explicit limit when the resident
    # buffers would not fit the smallest default scoped limit (large hidden
    # sizes); cap at v7x's 64 MiB physical VMEM.
    w_elt = jnp.dtype(w1.dtype).itemsize
    weight_bytes = (w1.size + w2.size + w3.size) * w_elt + \
                   (b1.size + b2.size + b3.size) * 4
    stream_bytes = tile_b * (s_dim * w_elt + out_dim * 4)
    vmem_bytes = 2 * (weight_bytes + stream_bytes)  # pipeline double-buffers
    vmem_limit = None
    if vmem_bytes > 12 * 1024 * 1024:
        vmem_limit = min(vmem_bytes + (4 << 20), 64 * 1024 * 1024)

    logits = pl.pallas_call(
        mlp_policy_kernel,
        out_shape=jax.ShapeDtypeStruct((b_pad, out_dim), jnp.float32),
        grid=(n_tiles,),
        in_specs=[
            x_spec,
            const_spec(w1.shape), const_spec(b1.shape),
            const_spec(w2.shape), const_spec(b2.shape),
            const_spec(w3.shape), const_spec(b3.shape),
        ],
        out_specs=o_spec,
        compiler_params=pltpu.CompilerParams(
            dimension_semantics=("parallel",),
            vmem_limit_bytes=vmem_limit),
    )(obs, w1, b1, w2, b2, w3, b3)

    if b_pad != batch:
        logits = logits[:batch]
    # .view(-1, action_num, action_seg)
    return logits.reshape(-1, action_num, action_seg)


def init_policy_params(key, state_dim, action_num, action_seg, hidden_size):
    """Deterministic synthetic parameter init (shapes match the PyTorch module).

    Weights are stored as (in_features, out_features) so the kernel computes
    x @ W directly on the MXU; biases are (1, out_features).
    """
    out_dim = action_num * action_seg
    k1, k2, k3, k4, k5, k6 = jax.random.split(key, 6)

    def lin(kw, kb, fan_in, fan_out):
        bound = 1.0 / jnp.sqrt(jnp.float32(fan_in))
        w = jax.random.uniform(kw, (fan_in, fan_out), jnp.float32, -bound, bound)
        b = jax.random.uniform(kb, (1, fan_out), jnp.float32, -bound, bound)
        return w, b

    w1, b1 = lin(k1, k2, state_dim, hidden_size)
    w2, b2 = lin(k3, k4, hidden_size, hidden_size)
    w3, b3 = lin(k5, k6, hidden_size, out_dim)
    return (w1, b1, w2, b2, w3, b3)


if __name__ == "__main__":
    # Small shapes consistent with the module.
    batch = 2
    state_dim = 16
    action_num, action_seg = 4, 8     # action_dim tuple
    hidden_size = 32

    key = jax.random.PRNGKey(0)
    k_obs, k_params = jax.random.split(key)

    obs = jax.random.normal(k_obs, (batch, state_dim), dtype=jnp.float32)
    raw_params = init_policy_params(k_params, state_dim, action_num,
                                    action_seg, hidden_size)
    # Pad/cast weights ONCE, outside the per-call forward.
    params = prepare_policy_params(raw_params)

    logits = policy_forward(obs, params,
                            action_num=action_num, action_seg=action_seg)
    logits = jax.block_until_ready(logits)

    assert logits.shape == (batch, action_num, action_seg), logits.shape
    assert logits.dtype == jnp.float32

    # Cross-check against a pure-JAX reference of the same math (raw params).
    w1, b1, w2, b2, w3, b3 = raw_params
    h1 = jnp.maximum(obs @ w1 + b1, 0.0)
    h2 = jnp.maximum(h1 @ w2 + b2, 0.0)
    ref = (h2 @ w3 + b3).reshape(-1, action_num, action_seg)
    assert jnp.allclose(logits, ref, atol=1e-5, rtol=1e-5)

    # Also exercise a larger, multi-tile batch to cover the gridded path
    # (2 grid steps -> both v7x TensorCores busy; ragged batch padding path).
    big_B = 600
    obs_big = jax.random.normal(jax.random.PRNGKey(1), (big_B, state_dim),
                                dtype=jnp.float32)
    logits_big = jax.block_until_ready(
        policy_forward(obs_big, params,
                       action_num=action_num, action_seg=action_seg))
    h1b = jnp.maximum(obs_big @ w1 + b1, 0.0)
    h2b = jnp.maximum(h1b @ w2 + b2, 0.0)
    ref_big = (h2b @ w3 + b3).reshape(-1, action_num, action_seg)
    assert logits_big.shape == (big_B, action_num, action_seg)
    assert jnp.allclose(logits_big, ref_big, atol=1e-4, rtol=1e-4)

    print("KERNEL_OK")
</pallas_src>

<mosaic_0001>
module attributes {stable_mosaic.version = 11 : i64} {
  func.func @mlp_policy_kernel(%arg0: i32, %arg1: memref<8x16xf32, #tpu.memory_space<vmem>>, %arg2: memref<16x128xf32, #tpu.memory_space<vmem>>, %arg3: memref<1x128xf32, #tpu.memory_space<vmem>>, %arg4: memref<128x128xf32, #tpu.memory_space<vmem>>, %arg5: memref<1x128xf32, #tpu.memory_space<vmem>>, %arg6: memref<128x32xf32, #tpu.memory_space<vmem>>, %arg7: memref<1x32xf32, #tpu.memory_space<vmem>>, %arg8: memref<8x32xf32, #tpu.memory_space<vmem>>) attributes {dimension_semantics = [#tpu.dimension_semantics<parallel>], iteration_bounds = array<i64: 1>, scalar_prefetch = 0 : i64, scratch_operands = 0 : i64, tpu.core_type = #tpu.core_type<tc>, window_params = [{transform_indices = @transform_0, window_bounds = array<i64: 8, 16>}, {pipeline_mode = #tpu.pipeline_mode<synchronous>, transform_indices = @transform_1, window_bounds = array<i64: 16, 128>}, {pipeline_mode = #tpu.pipeline_mode<synchronous>, transform_indices = @transform_2, window_bounds = array<i64: 1, 128>}, {pipeline_mode = #tpu.pipeline_mode<synchronous>, transform_indices = @transform_3, window_bounds = array<i64: 128, 128>}, {pipeline_mode = #tpu.pipeline_mode<synchronous>, transform_indices = @transform_4, window_bounds = array<i64: 1, 128>}, {pipeline_mode = #tpu.pipeline_mode<synchronous>, transform_indices = @transform_5, window_bounds = array<i64: 128, 32>}, {pipeline_mode = #tpu.pipeline_mode<synchronous>, transform_indices = @transform_6, window_bounds = array<i64: 1, 32>}, {transform_indices = @transform_7, window_bounds = array<i64: 8, 32>}]} {
    %c0 = arith.constant 0 : index
    %c0_0 = arith.constant 0 : index
    %0 = vector.load %arg1[%c0, %c0_0] : memref<8x16xf32, #tpu.memory_space<vmem>>, vector<8x16xf32>
    %c0_1 = arith.constant 0 : index
    %c0_2 = arith.constant 0 : index
    %1 = vector.load %arg2[%c0_1, %c0_2] : memref<16x128xf32, #tpu.memory_space<vmem>>, vector<16x128xf32>
    %cst = arith.constant dense<0.000000e+00> : vector<8x128xf32>
    %2 = tpu.matmul %0, %1, %cst {dimension_numbers = #tpu.dot_dimension_numbers<[1], [0], [0], [1], [0, 0, 1, 1], [], []>} : vector<8x16xf32>, vector<16x128xf32>, vector<8x128xf32> -> vector<8x128xf32>
    %c0_3 = arith.constant 0 : index
    %c0_4 = arith.constant 0 : index
    %3 = vector.load %arg3[%c0_3, %c0_4] : memref<1x128xf32, #tpu.memory_space<vmem>>, vector<1x128xf32>
    %4 = vector.broadcast %3 : vector<1x128xf32> to vector<8x128xf32>
    %5 = arith.addf %2, %4 : vector<8x128xf32>
    %cst_5 = arith.constant 0.000000e+00 : f32
    %6 = vector.broadcast %cst_5 : f32 to vector<8x128xf32>
    %7 = arith.maximumf %5, %6 : vector<8x128xf32>
    %c0_6 = arith.constant 0 : index
    %c0_7 = arith.constant 0 : index
    %8 = vector.load %arg4[%c0_6, %c0_7] : memref<128x128xf32, #tpu.memory_space<vmem>>, vector<128x128xf32>
    %cst_8 = arith.constant dense<0.000000e+00> : vector<8x128xf32>
    %9 = tpu.matmul %7, %8, %cst_8 {dimension_numbers = #tpu.dot_dimension_numbers<[1], [0], [0], [1], [0, 0, 1, 1], [], []>} : vector<8x128xf32>, vector<128x128xf32>, vector<8x128xf32> -> vector<8x128xf32>
    %c0_9 = arith.constant 0 : index
    %c0_10 = arith.constant 0 : index
    %10 = vector.load %arg5[%c0_9, %c0_10] : memref<1x128xf32, #tpu.memory_space<vmem>>, vector<1x128xf32>
    %11 = vector.broadcast %10 : vector<1x128xf32> to vector<8x128xf32>
    %12 = arith.addf %9, %11 : vector<8x128xf32>
    %cst_11 = arith.constant 0.000000e+00 : f32
    %13 = vector.broadcast %cst_11 : f32 to vector<8x128xf32>
    %14 = arith.maximumf %12, %13 : vector<8x128xf32>
    %c0_12 = arith.constant 0 : index
    %c0_13 = arith.constant 0 : index
    %15 = vector.load %arg6[%c0_12, %c0_13] : memref<128x32xf32, #tpu.memory_space<vmem>>, vector<128x32xf32>
    %cst_14 = arith.constant dense<0.000000e+00> : vector<8x32xf32>
    %16 = tpu.matmul %14, %15, %cst_14 {dimension_numbers = #tpu.dot_dimension_numbers<[1], [0], [0], [1], [0, 0, 1, 1], [], []>} : vector<8x128xf32>, vector<128x32xf32>, vector<8x32xf32> -> vector<8x32xf32>
    %c0_15 = arith.constant 0 : index
    %c0_16 = arith.constant 0 : index
    %17 = vector.load %arg7[%c0_15, %c0_16] : memref<1x32xf32, #tpu.memory_space<vmem>>, vector<1x32xf32>
    %18 = vector.broadcast %17 : vector<1x32xf32> to vector<8x32xf32>
    %19 = arith.addf %16, %18 : vector<8x32xf32>
    %c0_17 = arith.constant 0 : index
    %c0_18 = arith.constant 0 : index
    %20 = vector.load %arg8[%c0_17, %c0_18] : memref<8x32xf32, #tpu.memory_space<vmem>>, vector<8x32xf32>
    tpu.vector_store %arg8[%c0_17, %c0_18], %19 {strides = array<i32>} : memref<8x32xf32, #tpu.memory_space<vmem>>, vector<8x32xf32>,
    return
  }
  func.func @transform_0(%arg0: i32) -> (i32, i32) {
    %c0_i32 = arith.constant 0 : i32
    %c0_i32_0 = arith.constant 0 : i32
    return %arg0, %c0_i32 : i32, i32
  }
  func.func @transform_1(%arg0: i32) -> (i32, i32) {
    %c0_i32 = arith.constant 0 : i32
    %c0_i32_0 = arith.constant 0 : i32
    %c0_i32_1 = arith.constant 0 : i32
    return %c0_i32, %c0_i32_0 : i32, i32
  }
  func.func @transform_2(%arg0: i32) -> (i32, i32) {
    %c0_i32 = arith.constant 0 : i32
    %c0_i32_0 = arith.constant 0 : i32
    %c0_i32_1 = arith.constant 0 : i32
    return %c0_i32, %c0_i32_0 : i32, i32
  }
  func.func @transform_3(%arg0: i32) -> (i32, i32) {
    %c0_i32 = arith.constant 0 : i32
    %c0_i32_0 = arith.constant 0 : i32
    %c0_i32_1 = arith.constant 0 : i32
    return %c0_i32, %c0_i32_0 : i32, i32
  }
  func.func @transform_4(%arg0: i32) -> (i32, i32) {
    %c0_i32 = arith.constant 0 : i32
    %c0_i32_0 = arith.constant 0 : i32
    %c0_i32_1 = arith.constant 0 : i32
    return %c0_i32, %c0_i32_0 : i32, i32
  }
  func.func @transform_5(%arg0: i32) -> (i32, i32) {
    %c0_i32 = arith.constant 0 : i32
    %c0_i32_0 = arith.constant 0 : i32
    %c0_i32_1 = arith.constant 0 : i32
    return %c0_i32, %c0_i32_0 : i32, i32
  }
  func.func @transform_6(%arg0: i32) -> (i32, i32) {
    %c0_i32 = arith.constant 0 : i32
    %c0_i32_0 = arith.constant 0 : i32
    %c0_i32_1 = arith.constant 0 : i32
    return %c0_i32, %c0_i32_0 : i32, i32
  }
  func.func @transform_7(%arg0: i32) -> (i32, i32) {
    %c0_i32 = arith.constant 0 : i32
    %c0_i32_0 = arith.constant 0 : i32
    return %arg0, %c0_i32 : i32, i32
  }
}

</mosaic_0001>

<bundles_post_ra>
// kernel: policy_forward.1
= control target key start
LH: loop header
LB: loop body
LE: loop exit
PB: predicated region body
PF: predicated region fallthrough
CT: control target
= control target key end

     0   :  { %v424_v0 = vmov 0.0   ;;  %vm425_vm0 = vmmov 0   ;;  %vm36_vm1 = vcmask 130048   ;;  %vm298_vm2 = vcmask 261120   ;;  %s623_s1 = inlined_call_operand.vmem [shape: f32[16,128], index: 1, kind: input, shape index: {}]   ;;  %s624_s0 = inlined_call_operand.vmem [shape: f32[8,16], index: 0, kind: input, shape index: {}]   ;;  %s625_s3 = inlined_call_operand.vmem [shape: f32[128,128], index: 3, kind: input, shape index: {}]   ;;  %s626_s5 = inlined_call_operand.vmem [shape: f32[128,32], index: 5, kind: input, shape index: {}]   ;;  %s627_s2 = inlined_call_operand.vmem [shape: f32[1,128], index: 2, kind: input, shape index: {}]   ;;  %s628_s4 = inlined_call_operand.vmem [shape: f32[1,128], index: 4, kind: input, shape index: {}]   ;;  %s629_s6 = inlined_call_operand.vmem [shape: f32[1,32], index: 6, kind: input, shape index: {}]   ;;  %s630_s7 = inlined_call_operand.vmem [shape: f32[8,32], index: 7, kind: output, shape index: {}]  }
   0x1   :  { %345 = vmatprep.subr.mxu0 %v424_v0  ;;  %v28_v1 = vld [vmem:[%s623_s1 + $0x8] sm:$0xff]  ;;  %v27_v2 = vld [vmem:[%s623_s1] sm:$0xff]  ;;  %349 = vmatprep.mubr.msk.f32.mxu0 %vm425_vm0, %v424_v0  ;;  %v126_v4 = vld [vmem:[%s625_s3 + $0x78] sm:$0xff] }
   0x2   :  { %346 = vmatpush3.msra.mxu0 %v28_v1  ;;  %v26_v3 = vld [vmem:[%s624_s0] sm:$0xff]  ;;  %352 = vmatprep.subr.mxu1 %v424_v0  ;;  %v125_v5 = vld [vmem:[%s625_s3 + $0x70] sm:$0xff]  ;;  %v124_v6 = vld [vmem:[%s625_s3 + $0x68] sm:$0xff] }
   0x3   :  { %347 = vmatprep.subr.mxu0 %v424_v0  ;;  %353 = vmatpush3.msra.mxu1 %v126_v4  ;;  %v123_v7 = vld [vmem:[%s625_s3 + $0x60] sm:$0xff]  ;;  %v122_v8 = vld [vmem:[%s625_s3 + $0x58] sm:$0xff]  ;;  %v121_v9 = vld [vmem:[%s625_s3 + $0x50] sm:$0xff] }
   0x4   :  { %348 = vmatpush3.msra.mxu0 %v27_v2  ;;  %354 = vmatprep.subr.mxu1 %v424_v0  ;;  %v120_v10 = vld [vmem:[%s625_s3 + $0x48] sm:$0xff]  ;;  %v119_v11 = vld [vmem:[%s625_s3 + $0x40] sm:$0xff]  ;;  %v118_v12 = vld [vmem:[%s625_s3 + $0x38] sm:$0xff] }
   0x5   :  { %350 = vmatmul.mubr.msk.f32.vlgmr.msra.gmra.mxu0 %vm36_vm1, %v26_v3  ;;  %355 = vmatpush3.msra.mxu1 %v125_v5  ;;  %v117_v13 = vld [vmem:[%s625_s3 + $0x30] sm:$0xff]  ;;  %v116_v14 = vld [vmem:[%s625_s3 + $0x28] sm:$0xff]  ;;  %v115_v15 = vld [vmem:[%s625_s3 + $0x20] sm:$0xff] }
   0x6   :  { %356 = vmatprep.subr.mxu1 %v424_v0  ;;  %384 = vmatprep.mubr.msk.f32.mxu1 %vm425_vm0, %v424_v0  ;;  %v114_v16 = vld [vmem:[%s625_s3 + $0x18] sm:$0xff]  ;;  %v113_v17 = vld [vmem:[%s625_s3 + $0x10] sm:$0xff]  ;;  %v112_v18 = vld [vmem:[%s625_s3 + $0x8] sm:$0xff] }
   0x7   :  { %357 = vmatpush3.msra.mxu1 %v124_v6  ;;  %387 = vmatprep.subr.mxu0 %v424_v0  ;;  %v111_v19 = vld [vmem:[%s625_s3] sm:$0xff]  ;;  %v220_v20 = vld [vmem:[%s626_s5 + $0x78] sm:$0xff]  ;;  %v219_v21 = vld [vmem:[%s626_s5 + $0x70] sm:$0xff] }
   0x8   :  { %358 = vmatprep.subr.mxu1 %v424_v0  ;;  %419 = vmatprep.mubr.msk.f32.mxu0 %vm425_vm0, %v424_v0  ;;  %v218_v22 = vld [vmem:[%s626_s5 + $0x68] sm:$0xff]  ;;  %v217_v23 = vld [vmem:[%s626_s5 + $0x60] sm:$0xff]  ;;  %v216_v24 = vld [vmem:[%s626_s5 + $0x58] sm:$0xff] }
   0x9   :  { %359 = vmatpush3.msra.mxu1 %v123_v7  ;;  %388 = vmatpush3.msra.mxu0 %v220_v20  ;;  %v215_v25 = vld [vmem:[%s626_s5 + $0x50] sm:$0xff]  ;;  %v214_v26 = vld [vmem:[%s626_s5 + $0x48] sm:$0xff]  ;;  %v213_v27 = vld [vmem:[%s626_s5 + $0x40] sm:$0xff] }
   0xa   :  { %360 = vmatprep.subr.mxu1 %v424_v0  ;;  %389 = vmatprep.subr.mxu0 %v424_v0  ;;  %v212_v28 = vld [vmem:[%s626_s5 + $0x38] sm:$0xff]  ;;  %v211_v29 = vld [vmem:[%s626_s5 + $0x30] sm:$0xff]  ;;  %v210_v30 = vld [vmem:[%s626_s5 + $0x28] sm:$0xff] }
   0xb   :  { %361 = vmatpush3.msra.mxu1 %v122_v8  ;;  %390 = vmatpush3.msra.mxu0 %v219_v21  ;;  %v209_v31 = vld [vmem:[%s626_s5 + $0x20] sm:$0xff]  ;;  %v208_v32 = vld [vmem:[%s626_s5 + $0x18] sm:$0xff]  ;;  %v207_v38 = vld [vmem:[%s626_s5 + $0x10] sm:$0xff] }
   0xc   :  { %362 = vmatprep.subr.mxu1 %v424_v0  ;;  %391 = vmatprep.subr.mxu0 %v424_v0  ;;  %v304_v33 = vld [vmem:[%s627_s2] ss:$0 sm:$0xff]  ;;  %v206_v39 = vld [vmem:[%s626_s5 + $0x8] sm:$0xff] }
   0xd   :  { %363 = vmatpush3.msra.mxu1 %v121_v9  ;;  %392 = vmatpush3.msra.mxu0 %v218_v22  ;;  %v205_v40 = vld [vmem:[%s626_s5] sm:$0xff] }
   0xe   :  { %364 = vmatprep.subr.mxu1 %v424_v0  ;;  %393 = vmatprep.subr.mxu0 %v424_v0  ;;  %v306_v41 = vld [vmem:[%s628_s4] ss:$0 sm:$0xff] }
   0xf   :  { %365 = vmatpush3.msra.mxu1 %v120_v10  ;;  %394 = vmatpush3.msra.mxu0 %v217_v23  ;;  %v307_v46 = vld [vmem:[%s629_s6] ss:$0 sm:$0xff] }
  0x10   :  { %366 = vmatprep.subr.mxu1 %v424_v0  ;;  %395 = vmatprep.subr.mxu0 %v424_v0 }
  0x11   :  { %367 = vmatpush3.msra.mxu1 %v119_v11  ;;  %396 = vmatpush3.msra.mxu0 %v216_v24 }
  0x12   :  { %368 = vmatprep.subr.mxu1 %v424_v0  ;;  %397 = vmatprep.subr.mxu0 %v424_v0 }
  0x13   :  { %369 = vmatpush3.msra.mxu1 %v118_v12  ;;  %398 = vmatpush3.msra.mxu0 %v215_v25 }
  0x14   :  { %370 = vmatprep.subr.mxu1 %v424_v0  ;;  %399 = vmatprep.subr.mxu0 %v424_v0 }
  0x15   :  { %371 = vmatpush3.msra.mxu1 %v117_v13  ;;  %400 = vmatpush3.msra.mxu0 %v214_v26 }
  0x16   :  { %372 = vmatprep.subr.mxu1 %v424_v0  ;;  %401 = vmatprep.subr.mxu0 %v424_v0 }
  0x17   :  { %373 = vmatpush3.msra.mxu1 %v116_v14  ;;  %402 = vmatpush3.msra.mxu0 %v213_v27 }
  0x18   :  { %374 = vmatprep.subr.mxu1 %v424_v0  ;;  %403 = vmatprep.subr.mxu0 %v424_v0 }
  0x19   :  { %375 = vmatpush3.msra.mxu1 %v115_v15  ;;  %404 = vmatpush3.msra.mxu0 %v212_v28 }
  0x1a   :  { %376 = vmatprep.subr.mxu1 %v424_v0  ;;  %405 = vmatprep.subr.mxu0 %v424_v0 }
  0x1b   :  { %377 = vmatpush3.msra.mxu1 %v114_v16  ;;  %406 = vmatpush3.msra.mxu0 %v211_v29 }
  0x1c   :  { %378 = vmatprep.subr.mxu1 %v424_v0  ;;  %407 = vmatprep.subr.mxu0 %v424_v0 }
  0x1d   :  { %379 = vmatpush3.msra.mxu1 %v113_v17  ;;  %408 = vmatpush3.msra.mxu0 %v210_v30 }
  0x1e   :  { %380 = vmatprep.subr.mxu1 %v424_v0  ;;  %409 = vmatprep.subr.mxu0 %v424_v0 }
  0x1f   :  { %381 = vmatpush3.msra.mxu1 %v112_v18  ;;  %410 = vmatpush3.msra.mxu0 %v209_v31 }
  0x20   :  { %382 = vmatprep.subr.mxu1 %v424_v0  ;;  %411 = vmatprep.subr.mxu0 %v424_v0 }
  0x21   :  { %383 = vmatpush3.msra.mxu1 %v111_v19  ;;  %412 = vmatpush3.msra.mxu0 %v208_v32 }
  0x22   :  { %413 = vmatprep.subr.mxu0 %v424_v0 }
  0x23   :  { %414 = vmatpush3.msra.mxu0 %v207_v38 }
  0x24   :  { %415 = vmatprep.subr.mxu0 %v424_v0 }
  0x25   :  { %416 = vmatpush3.msra.mxu0 %v206_v39 }
  0x26   :  { %417 = vmatprep.subr.mxu0 %v424_v0 }
  0x27   :  { %418 = vmatpush3.msra.mxu0 %v205_v40 }
  0xc5   :  { %v106_v34 = vpop.f32.mrf.mxu0 }
  0xc6   :  { %v107_v35 = vadd.f32 %v304_v33, %v106_v34 }
  0xc7   :  { %v351_v36 = vpop.f32.mrf.mxu0 }
  0xc8   :  { %v110_v37 = vmax.f32 %v107_v35, 0.0 }
  0xca   :  { %385 = vmatmul.mubr.f32.vlgmr.msra.gmra.mxu1 %v110_v37 }
 0x18a   :  { %v200_v42 = vpop.f32.mrf.mxu1 }
 0x18b   :  { %v201_v43 = vadd.f32 %v306_v41, %v200_v42 }
 0x18c   :  { %v386_v44 = vpop.f32.mrf.mxu1 }
 0x18d   :  { %v204_v45 = vmax.f32 %v201_v43, 0.0 }
 0x18f   :  { %420 = vmatmul.mubr.f32.vlgmr.msra.gmra.mxu0 %v204_v45 }
 0x24f   :  { %v294_v47 = vpop.f32.mrf.mxu0 }
 0x250   :  { %v295_v48 = vadd.f32 %v307_v46, %v294_v47 }
 0x251   :  { %v421_v49 = vpop.f32.mrf.mxu0 }
 0x252   :  { %299 = vst.msk [vmem:[%s630_s7] sm:$0xff] %vm298_vm2, %v295_v48 }

</bundles_post_ra>
